<compile_context>
chip_gen: v6e
topology: v6e:2x2x1
jax: 0.10.0
libtpu: 0.0.40
codegen_flags: <defaults>
</compile_context>

<pallas_src>
import math

import jax
import jax.numpy as jnp
from jax.experimental import pallas as pl
from jax.experimental.pallas import tpu as pltpu


def mlp_residual_kernel(x_ref, w1_ref, b1_ref, w2_ref, b2_ref, w3_ref, b3_ref,
                        o_ref):
    """One batch tile of relu(relu(x@W1+b1)@W2+b2)@W3 + b3 + x[:,4:5] (all f32)."""
    x = x_ref[...]                                           # (TM, D_in) f32

    # hidden layer 1 (MXU matmul, f32 accumulate; bias/ReLU on the VPU)
    h = jnp.dot(x, w1_ref[...], preferred_element_type=jnp.float32)
    h = jnp.maximum(h + b1_ref[...], 0.0)

    # hidden layer 2
    h = jnp.dot(h, w2_ref[...], preferred_element_type=jnp.float32)
    h = jnp.maximum(h + b2_ref[...], 0.0)

    # output layer + exact residual (lane slice + broadcast, no extra matmul)
    out = jnp.dot(h, w3_ref[...], preferred_element_type=jnp.float32)
    o_ref[...] = out + b3_ref[...] + x[:, 4:5]


def _choose_tiling(batch, target_rows=8192):
    """Pick (tm, n_tiles).

    Per-grid-step overhead is ~0.35 us, so tiles must be large. Small/medium
    batches use a single tile covering the whole batch (block == full array, so
    no sublane-alignment or padding is needed). Large batches get ~target_rows
    row tiles with an even tile count so both v7x TensorCores are used.
    """
    if batch <= 4096:
        return batch, 1
    n_tiles = max(2, 2 * pl.cdiv(batch, 2 * target_rows))   # even for v7x 2 TCs
    tm = ((pl.cdiv(batch, n_tiles) + 7) // 8) * 8           # multiple of 8 rows
    return tm, pl.cdiv(batch, tm)


def nn_model_forward(x, params, *, tm=None):
    """params = [(W1, b1), (W2, b2), (W3, b3)], W_i: (in, out) f32, b_i: (1, out) f32."""
    (w1, b1), (w2, b2), (w3, b3) = params
    batch, d_in = x.shape
    h1 = w1.shape[1]
    h2 = w2.shape[1]
    out_dim = w3.shape[1]

    # Fail loudly on layout misuse (forward uses x[:, 4]; weights are (in, out)).
    assert d_in > 4, "input_dim must be > 4 (forward reads x[:, 4])"
    assert w1.shape[0] == d_in and w2.shape[0] == h1 and w3.shape[0] == h2, \
        "weights must be stored (in, out)"
    assert b1.shape == (1, h1) and b2.shape == (1, h2) and b3.shape == (1, out_dim)

    if tm is None:
        tm, n_tiles = _choose_tiling(batch)
    else:
        n_tiles = pl.cdiv(batch, tm)

    flops = 2 * batch * (d_in * h1 + h1 * h2 + h2 * out_dim)
    bytes_accessed = 4 * (x.size + batch * out_dim
                          + w1.size + w2.size + w3.size
                          + b1.size + b2.size + b3.size)

    def resident(a):  # whole array, same block every grid step -> DMA'd once
        return pl.BlockSpec(a.shape, lambda i: (0, 0))

    out = pl.pallas_call(
        mlp_residual_kernel,
        out_shape=jax.ShapeDtypeStruct((batch, out_dim), jnp.float32),
        grid_spec=pltpu.PrefetchScalarGridSpec(
            num_scalar_prefetch=0,
            grid=(n_tiles,),
            in_specs=[
                pl.BlockSpec((tm, d_in), lambda i: (i, 0)),   # streamed batch tile
                resident(w1), resident(b1),
                resident(w2), resident(b2),
                resident(w3), resident(b3),
            ],
            out_specs=pl.BlockSpec((tm, out_dim), lambda i: (i, 0)),
        ),
        compiler_params=pltpu.CompilerParams(
            dimension_semantics=("parallel",)),   # shards batch tiles across TCs
        cost_estimate=pl.CostEstimate(
            flops=flops, transcendentals=0, bytes_accessed=bytes_accessed),
    )(x, w1, b1, w2, b2, w3, b3)

    return out


def init_linear(key, fan_in, fan_out):
    """Deterministic init mimicking torch.nn.Linear (uniform +-1/sqrt(fan_in))."""
    kw, kb = jax.random.split(key)
    bound = 1.0 / math.sqrt(fan_in)
    w = jax.random.uniform(kw, (fan_in, fan_out), jnp.float32, -bound, bound)
    b = jax.random.uniform(kb, (1, fan_out), jnp.float32, -bound, bound)
    return w, b


if __name__ == "__main__":
    # Small shapes consistent with the module: input_dim must be > 4 (uses x[:, 4]).
    batch = 8
    input_dim = 16
    hidden_layers = [32, 32]
    output_dim = 4

    key = jax.random.PRNGKey(0)
    k_x, k1, k2, k3 = jax.random.split(key, 4)

    x = jax.random.normal(k_x, (batch, input_dim), jnp.float32)

    params = [
        init_linear(k1, input_dim, hidden_layers[0]),
        init_linear(k2, hidden_layers[0], hidden_layers[1]),
        init_linear(k3, hidden_layers[1], output_dim),
    ]

    out = jax.block_until_ready(nn_model_forward(x, params))
    assert out.shape == (batch, output_dim)

    # Full-f32 reference (exactly the PyTorch module's forward math).
    def ref_f32(x, params):
        (w1, b1), (w2, b2), (w3, b3) = params
        h = jnp.maximum(x @ w1 + b1, 0.0)
        h = jnp.maximum(h @ w2 + b2, 0.0)
        return h @ w3 + b3 + x[:, 4:5]

    assert jnp.allclose(out, ref_f32(x, params), atol=1e-5, rtol=1e-5)

    print("KERNEL_OK")
</pallas_src>

<mosaic_0001>
module attributes {stable_mosaic.version = 11 : i64} {
  func.func @mlp_residual_kernel(%arg0: i32, %arg1: memref<8x16xf32, #tpu.memory_space<vmem>>, %arg2: memref<16x32xf32, #tpu.memory_space<vmem>>, %arg3: memref<1x32xf32, #tpu.memory_space<vmem>>, %arg4: memref<32x32xf32, #tpu.memory_space<vmem>>, %arg5: memref<1x32xf32, #tpu.memory_space<vmem>>, %arg6: memref<32x4xf32, #tpu.memory_space<vmem>>, %arg7: memref<1x4xf32, #tpu.memory_space<vmem>>, %arg8: memref<8x4xf32, #tpu.memory_space<vmem>>) attributes {dimension_semantics = [#tpu.dimension_semantics<parallel>], iteration_bounds = array<i64: 1>, scalar_prefetch = 0 : i64, scratch_operands = 0 : i64, tpu.core_type = #tpu.core_type<tc>, window_params = [{transform_indices = @transform_0, window_bounds = array<i64: 8, 16>}, {pipeline_mode = #tpu.pipeline_mode<synchronous>, transform_indices = @transform_1, window_bounds = array<i64: 16, 32>}, {pipeline_mode = #tpu.pipeline_mode<synchronous>, transform_indices = @transform_2, window_bounds = array<i64: 1, 32>}, {pipeline_mode = #tpu.pipeline_mode<synchronous>, transform_indices = @transform_3, window_bounds = array<i64: 32, 32>}, {pipeline_mode = #tpu.pipeline_mode<synchronous>, transform_indices = @transform_4, window_bounds = array<i64: 1, 32>}, {pipeline_mode = #tpu.pipeline_mode<synchronous>, transform_indices = @transform_5, window_bounds = array<i64: 32, 4>}, {pipeline_mode = #tpu.pipeline_mode<synchronous>, transform_indices = @transform_6, window_bounds = array<i64: 1, 4>}, {transform_indices = @transform_7, window_bounds = array<i64: 8, 4>}]} {
    %c0 = arith.constant 0 : index
    %c0_0 = arith.constant 0 : index
    %0 = vector.load %arg1[%c0, %c0_0] : memref<8x16xf32, #tpu.memory_space<vmem>>, vector<8x16xf32>
    %c0_1 = arith.constant 0 : index
    %c0_2 = arith.constant 0 : index
    %1 = vector.load %arg2[%c0_1, %c0_2] : memref<16x32xf32, #tpu.memory_space<vmem>>, vector<16x32xf32>
    %cst = arith.constant dense<0.000000e+00> : vector<8x32xf32>
    %2 = tpu.matmul %0, %1, %cst {dimension_numbers = #tpu.dot_dimension_numbers<[1], [0], [0], [1], [0, 0, 1, 1], [], []>} : vector<8x16xf32>, vector<16x32xf32>, vector<8x32xf32> -> vector<8x32xf32>
    %c0_3 = arith.constant 0 : index
    %c0_4 = arith.constant 0 : index
    %3 = vector.load %arg3[%c0_3, %c0_4] : memref<1x32xf32, #tpu.memory_space<vmem>>, vector<1x32xf32>
    %4 = vector.broadcast %3 : vector<1x32xf32> to vector<8x32xf32>
    %5 = arith.addf %2, %4 : vector<8x32xf32>
    %cst_5 = arith.constant 0.000000e+00 : f32
    %6 = vector.broadcast %cst_5 : f32 to vector<8x32xf32>
    %7 = arith.maximumf %5, %6 : vector<8x32xf32>
    %c0_6 = arith.constant 0 : index
    %c0_7 = arith.constant 0 : index
    %8 = vector.load %arg4[%c0_6, %c0_7] : memref<32x32xf32, #tpu.memory_space<vmem>>, vector<32x32xf32>
    %cst_8 = arith.constant dense<0.000000e+00> : vector<8x32xf32>
    %9 = tpu.matmul %7, %8, %cst_8 {dimension_numbers = #tpu.dot_dimension_numbers<[1], [0], [0], [1], [0, 0, 1, 1], [], []>} : vector<8x32xf32>, vector<32x32xf32>, vector<8x32xf32> -> vector<8x32xf32>
    %c0_9 = arith.constant 0 : index
    %c0_10 = arith.constant 0 : index
    %10 = vector.load %arg5[%c0_9, %c0_10] : memref<1x32xf32, #tpu.memory_space<vmem>>, vector<1x32xf32>
    %11 = vector.broadcast %10 : vector<1x32xf32> to vector<8x32xf32>
    %12 = arith.addf %9, %11 : vector<8x32xf32>
    %cst_11 = arith.constant 0.000000e+00 : f32
    %13 = vector.broadcast %cst_11 : f32 to vector<8x32xf32>
    %14 = arith.maximumf %12, %13 : vector<8x32xf32>
    %c0_12 = arith.constant 0 : index
    %c0_13 = arith.constant 0 : index
    %15 = vector.load %arg6[%c0_12, %c0_13] : memref<32x4xf32, #tpu.memory_space<vmem>>, vector<32x4xf32>
    %cst_14 = arith.constant dense<0.000000e+00> : vector<8x4xf32>
    %16 = tpu.matmul %14, %15, %cst_14 {dimension_numbers = #tpu.dot_dimension_numbers<[1], [0], [0], [1], [0, 0, 1, 1], [], []>} : vector<8x32xf32>, vector<32x4xf32>, vector<8x4xf32> -> vector<8x4xf32>
    %c0_15 = arith.constant 0 : index
    %c0_16 = arith.constant 0 : index
    %17 = vector.load %arg7[%c0_15, %c0_16] : memref<1x4xf32, #tpu.memory_space<vmem>>, vector<1x4xf32>
    %18 = vector.broadcast %17 : vector<1x4xf32> to vector<8x4xf32>
    %19 = arith.addf %16, %18 : vector<8x4xf32>
    %20 = vector.extract_strided_slice %0 {offsets = [0, 4], sizes = [8, 1], strides = [1, 1]} : vector<8x16xf32> to vector<8x1xf32>
    %21 = vector.broadcast %20 : vector<8x1xf32> to vector<8x4xf32>
    %22 = arith.addf %19, %21 : vector<8x4xf32>
    %c0_17 = arith.constant 0 : index
    %c0_18 = arith.constant 0 : index
    %23 = vector.load %arg8[%c0_17, %c0_18] : memref<8x4xf32, #tpu.memory_space<vmem>>, vector<8x4xf32>
    tpu.vector_store %arg8[%c0_17, %c0_18], %22 {strides = array<i32>} : memref<8x4xf32, #tpu.memory_space<vmem>>, vector<8x4xf32>,
    return
  }
  func.func @transform_0(%arg0: i32) -> (i32, i32) {
    %c0_i32 = arith.constant 0 : i32
    %c0_i32_0 = arith.constant 0 : i32
    return %arg0, %c0_i32 : i32, i32
  }
  func.func @transform_1(%arg0: i32) -> (i32, i32) {
    %c0_i32 = arith.constant 0 : i32
    %c0_i32_0 = arith.constant 0 : i32
    %c0_i32_1 = arith.constant 0 : i32
    return %c0_i32, %c0_i32_0 : i32, i32
  }
  func.func @transform_2(%arg0: i32) -> (i32, i32) {
    %c0_i32 = arith.constant 0 : i32
    %c0_i32_0 = arith.constant 0 : i32
    %c0_i32_1 = arith.constant 0 : i32
    return %c0_i32, %c0_i32_0 : i32, i32
  }
  func.func @transform_3(%arg0: i32) -> (i32, i32) {
    %c0_i32 = arith.constant 0 : i32
    %c0_i32_0 = arith.constant 0 : i32
    %c0_i32_1 = arith.constant 0 : i32
    return %c0_i32, %c0_i32_0 : i32, i32
  }
  func.func @transform_4(%arg0: i32) -> (i32, i32) {
    %c0_i32 = arith.constant 0 : i32
    %c0_i32_0 = arith.constant 0 : i32
    %c0_i32_1 = arith.constant 0 : i32
    return %c0_i32, %c0_i32_0 : i32, i32
  }
  func.func @transform_5(%arg0: i32) -> (i32, i32) {
    %c0_i32 = arith.constant 0 : i32
    %c0_i32_0 = arith.constant 0 : i32
    %c0_i32_1 = arith.constant 0 : i32
    return %c0_i32, %c0_i32_0 : i32, i32
  }
  func.func @transform_6(%arg0: i32) -> (i32, i32) {
    %c0_i32 = arith.constant 0 : i32
    %c0_i32_0 = arith.constant 0 : i32
    %c0_i32_1 = arith.constant 0 : i32
    return %c0_i32, %c0_i32_0 : i32, i32
  }
  func.func @transform_7(%arg0: i32) -> (i32, i32) {
    %c0_i32 = arith.constant 0 : i32
    %c0_i32_0 = arith.constant 0 : i32
    return %arg0, %c0_i32 : i32, i32
  }
}

</mosaic_0001>

<bundles_post_ra>
// kernel: tpu_custom_call.1
= control target key start
LH: loop header
LB: loop body
LE: loop exit
PB: predicated region body
PF: predicated region fallthrough
CT: control target
= control target key end

     0   :  { %12 = vsyncpa [#allocation3], 0  ;;  %s514_s0 = inlined_call_operand.vmem [shape: f32[8,16], index: 0, kind: input, shape index: {}]   ;;  %s515_s1 = inlined_call_operand.hbm [shape: f32[16,32], index: 1, kind: input, shape index: {}]   ;;  %s516_s2 = inlined_call_operand.vmem [shape: f32[1,32], index: 2, kind: input, shape index: {}]   ;;  %s517_s3 = inlined_call_operand.vmem [shape: f32[32,32], index: 3, kind: input, shape index: {}]   ;;  %s518_s4 = inlined_call_operand.hbm [shape: f32[1,32], index: 4, kind: input, shape index: {}]   ;;  %s519_s5 = inlined_call_operand.vmem [shape: f32[32,4], index: 5, kind: input, shape index: {}]   ;;  %s520_s6 = inlined_call_operand.vmem [shape: f32[1,4], index: 6, kind: input, shape index: {}]   ;;  %s521_s7 = inlined_call_operand.vmem [shape: f32[8,4], index: 7, kind: output, shape index: {}]  }
   0x1   :  { %13 = vsyncpa [#allocation5], 0  ;;  %s420_s24 = smov [#allocation2]  }
   0x2   :  { %s21_s25 = sshll.u32 %s420_s24, 4  ;;  %s22_s25 = int_to_ptr.vmem [resolvable:$true] %s21_s25 }
   0x3   :  { %s384_s26 = scalar_lea.vmem %s22_s25, 256  ;;  %p389_p1 = scmp.lt.s32.totalorder %s22_s25, %s22_s25 }
   0x4   :  { %p385_p0 = scmp.ne.s32.totalorder %s22_s25, %s384_s26  ;;  %p390_p2 = scmp.lt.s32.totalorder %s384_s26, %s384_s26 }
   0x6   :  { %p391_p3 = por %p390_p2, %p389_p1 }
   0x8   :  { %p392_p4 = pnand %p391_p3, %p385_p0 }
   0xa   :  { %395 = shalt.err (!%p392_p4)
}
   0xb   :  { %s421_s27 = smov 128   ;;  %s422_s28 = smov 8  }
   0xc   :  { %27 = dma.hbm_to_vmem [thread:$0]  %s515_s1, 256, %s22_s25, [#allocation3], %s421_s27, %s421_s27, %s422_s28  }
   0xd   :  { %s423_s8 = smov [#allocation4]  }
   0xe   :  { %s38_s9 = sshll.u32 %s423_s8, 4  ;;  %s39_s9 = int_to_ptr.vmem [resolvable:$true] %s38_s9 }
   0xf   :  { %s404_s10 = scalar_lea.vmem %s39_s9, 16  ;;  %s408_s11 = scalar_lea.vmem %s39_s9, 32 }
  0x10   :  { %p405_p5 = scmp.ne.s32.totalorder %s39_s9, %s404_s10  ;;  %p409_p6 = scmp.lt.s32.totalorder %s39_s9, %s39_s9 }
  0x11   :  { %p410_p7 = scmp.lt.s32.totalorder %s408_s11, %s404_s10 }
  0x13   :  { %p411_p8 = por %p410_p7, %p409_p6 }
  0x15   :  { %p412_p9 = pnand %p411_p8, %p405_p5 }
  0x17   :  { %415 = shalt.err (!%p412_p9)
}
  0x18   :  { %41 = dma.hbm_to_vmem [thread:$0]  %s518_s4, 16, %s39_s9, [#allocation5]  }
  0x19   :  { %416 = dma.done.wait [#allocation3], 256  }
  0x1a   :  { %417 = vsyncadd [#allocation3], 4294967040 }
  0x1b   :  { %418 = dma.done.wait [#allocation5], 16  }
  0x1c   :  { %419 = vsyncadd [#allocation5], 4294967280  ;;  %v424_v0 = vmov 0.0   ;;  %vm425_vm0 = vmmov 0   ;;  %v54_v1 = vld [vmem:[#allocation2 + $0x8] sm:$0xff]  ;;  %v53_v2 = vld [vmem:[#allocation2] sm:$0xff] }
  0x1d   :  { %339 = vmatprep.subr.mxu0 %v424_v0  ;;  %343 = vmatprep.mubr.msk.f32.mxu0 %vm425_vm0, %v424_v0  ;;  %v52_v3 = vld [vmem:[%s514_s0] sm:$0xff]  ;;  %vm62_vm1 = vcmask 130048   ;;  %v140_v4 = vld [vmem:[%s517_s3 + $0x18] sm:$0xff]  ;;  %v139_v5 = vld [vmem:[%s517_s3 + $0x10] sm:$0xff]  ;;  %vm148_vm2 = vcmask 261120   ;;  %v426_v17 = vmov 4  }
  0x1e   :  { %346 = vmatprep.subr.mxu1 %v424_v0  ;;  %354 = vmatprep.mubr.msk.f32.mxu1 %vm425_vm0, %v424_v0  ;;  %v138_v6 = vld [vmem:[%s517_s3 + $0x8] sm:$0xff]  ;;  %v137_v7 = vld [vmem:[%s517_s3] sm:$0xff]  ;;  %v226_v8 = vld [vmem:[%s519_s5 + $0x18] sm:$0xff]  ;;  %vm312_vm3 = vcmask 31744  }
  0x1f   :  { %340 = vmatpush3.msra.mxu0 %v54_v1  ;;  %347 = vmatpush3.msra.mxu1 %v140_v4  ;;  %v320_v9 = vld [vmem:[%s516_s2] ss:$0 sm:$0xff]  ;;  %v225_v14 = vld [vmem:[%s519_s5 + $0x10] sm:$0xff]  ;;  %v224_v15 = vld [vmem:[%s519_s5 + $0x8] sm:$0xff] }
  0x20   :  { %341 = vmatprep.subr.mxu0 %v424_v0  ;;  %348 = vmatprep.subr.mxu1 %v424_v0  ;;  %v223_v16 = vld [vmem:[%s519_s5] sm:$0xff]  ;;  %v322_v18 = vld [vmem:[#allocation4] ss:$0 sm:$0xff] }
  0x21   :  { %342 = vmatpush3.msra.mxu0 %v53_v2  ;;  %349 = vmatpush3.msra.mxu1 %v139_v5  ;;  %v324_v23 = vld [vmem:[%s520_s6] ss:$0 sm:$0xff] }
  0x22   :  { %344 = vmatmul.mubr.msk.f32.vlgmr.msra.gmra.mxu0 %vm62_vm1, %v52_v3  ;;  %357 = vmatprep.subr.mxu0 %v424_v0 }
  0x23   :  { %365 = vmatprep.mubr.msk.f32.mxu0 %vm425_vm0, %v424_v0  ;;  %350 = vmatprep.subr.mxu1 %v424_v0 }
  0x24   :  { %351 = vmatpush3.msra.mxu1 %v138_v6  ;;  %358 = vmatpush3.msra.mxu0 %v226_v8 }
  0x25   :  { %352 = vmatprep.subr.mxu1 %v424_v0  ;;  %359 = vmatprep.subr.mxu0 %v424_v0 }
  0x26   :  { %353 = vmatpush3.msra.mxu1 %v137_v7  ;;  %360 = vmatpush3.msra.mxu0 %v225_v14 }
  0x27   :  { %361 = vmatprep.subr.mxu0 %v424_v0  ;;  %375 = vset.pattern.permute.xlu0 %v426_v17 }
  0x28   :  { %362 = vmatpush3.msra.mxu0 %v224_v15  ;;  %308 = vperm.xlu0 %375, %v52_v3  }
  0x29   :  { %363 = vmatprep.subr.mxu0 %v424_v0 }
  0x2a   :  { %364 = vmatpush3.msra.mxu0 %v223_v16 }
  0xa3   :  { %v309_v25 = vpop.permute.xlu0 %308 }
  0xe2   :  { %v132_v10 = vpop.f32.mrf.mxu0 }
  0xe3   :  { %v133_v11 = vadd.f32 %v320_v9, %v132_v10 }
  0xe4   :  { %v345_v12 = vpop.f32.mrf.mxu0 }
  0xe5   :  { %v136_v13 = vmax.f32 %v133_v11, 0.0 }
  0xe7   :  { %355 = vmatmul.mubr.msk.f32.vlgmr.msra.gmra.mxu1 %vm148_vm2, %v136_v13 }
 0x1a7   :  { %v218_v19 = vpop.f32.mrf.mxu1 }
 0x1a8   :  { %v219_v20 = vadd.f32 %v322_v18, %v218_v19 }
 0x1a9   :  { %v356_v21 = vpop.f32.mrf.mxu1 }
 0x1aa   :  { %v222_v22 = vmax.f32 %v219_v20, 0.0 }
 0x1ac   :  { %366 = vmatmul.mubr.msk.f32.vlgmr.msra.gmra.mxu0 %vm148_vm2, %v222_v22 }
 0x26c   :  { %v303_v24 = vpop.f32.mrf.mxu0 }
 0x26d   :  { %v304_v26 = vadd.f32 %v324_v23, %v303_v24 }
 0x26e   :  { %v367_v27 = vpop.f32.mrf.mxu0 }
 0x26f   :  { %v311_v28 = vadd.f32 %v309_v25, %v304_v26 }
 0x271   :  { %313 = vst.msk [vmem:[%s521_s7] sm:$0xff] %vm312_vm3, %v311_v28 }
 0x272   :  { %318 = vsyncpa [#allocation3], 1 }
 0x273   :  { %319 = vsyncpa [#allocation5], 1 }

</bundles_post_ra>
